<compile_context>
chip_gen: v7x
topology: tpu7x:2x2x1
jax: 0.10.0
libtpu: 0.0.40
codegen_flags: <defaults>
</compile_context>

<pallas_src>
import functools

import jax
import jax.numpy as jnp
from jax import lax
from jax.experimental import pallas as pl
from jax.experimental.pallas import tpu as pltpu

LN_EPS = 1e-5   # PyTorch nn.LayerNorm default
NSTAT = 8       # stats columns (4 real p2 chunks + 4 zero padding, sublane-friendly)


def _expand_norm_shuffle_kernel(x_ref, w_ref, g_ref, b_ref, rmat_ref, bmat_ref,
                                o_ref, *, c4, inv_dim, resident_w):
    # x_ref   : (n, dim)            n = th*W tokens of one (batch, h-row-tile)
    # w_ref   : (dim, 16*dim) if resident_w else (dim, 4*dim)  [p1 slice]
    # g_ref   : (1, 4*dim)  gamma tiled over p2
    # b_ref   : (1, 4*dim)  beta tiled over p2
    # rmat_ref: (4*dim, NSTAT)  chunk-sum reduction matrix (constant)
    # bmat_ref: (NSTAT, 4*dim)  chunk broadcast matrix (constant)
    # o_ref   : (th, W, 4*dim)  -> output image rows 4*h + p1, layout (w, p2, c)
    th, W, _ = o_ref.shape

    if resident_w:
        p1 = pl.program_id(2)
        start = pl.multiple_of(p1 * c4, c4)      # c4 is a multiple of 128 here
        w = w_ref[:, pl.ds(start, c4)]
    else:
        w = w_ref[...]

    # Linear expand (no bias) for this p1 slice, f32 accumulation on the MXU.
    y = jnp.dot(x_ref[...], w, preferred_element_type=jnp.float32)      # (n, c4)

    # Per-dim-chunk LayerNorm stats via tiny MXU reductions: no (n,4,dim)
    # relayouts of the 16x-expanded tensor, everything stays lane-dense.
    s1 = jnp.dot(y, rmat_ref[...], preferred_element_type=jnp.float32)       # (n, NSTAT)
    s2 = jnp.dot(y * y, rmat_ref[...], preferred_element_type=jnp.float32)   # (n, NSTAT)
    mean = s1 * inv_dim
    var = s2 * inv_dim - mean * mean             # E[y^2] - mean^2 (no `centered` temp)
    inv = lax.rsqrt(var + LN_EPS)                # (n, NSTAT)
    mean_b = jnp.dot(mean, bmat_ref[...], preferred_element_type=jnp.float32)  # (n, c4)
    inv_b = jnp.dot(inv, bmat_ref[...], preferred_element_type=jnp.float32)    # (n, c4)

    # (y - mean) * (inv * gamma) + beta, written straight to the output block.
    out = (y - mean_b) * (inv_b * g_ref[...]) + b_ref[...]
    o_ref[...] = out.reshape(th, W, c4).astype(o_ref.dtype)   # leading-dim split only


def _vmem_capacity_bytes():
    try:
        return int(pltpu.get_tpu_info().vmem_capacity_bytes)
    except Exception:
        return 64 * 1024 * 1024     # conservative (v7x-class) fallback


def _pick_h_tile(H, W, max_block_rows, full_rows_ok):
    """Largest divisor th of H with th*W <= max_block_rows and (th*W) % 8 == 0."""
    fallback = None
    for th in range(H, 0, -1):
        if H % th:
            continue
        if (th * W) % 8:
            continue
        if th * W <= max_block_rows:
            return th
        fallback = th   # smallest valid divisor seen (all of them exceed the cap)
    if fallback is not None:
        return fallback
    if full_rows_ok:
        # B == 1: the (H*W, dim) block equals the full array, exempt from %8 rule.
        return H
    # TODO(synk): support B>1 shapes where no h-tile gives (th*W) % 8 == 0.
    raise ValueError(f"Cannot tile H={H}, W={W} into (mult-of-8 x W) row blocks.")


@functools.partial(jax.jit, static_argnames=("input_resolution", "out_dtype"))
def final_patch_expand_x4(x, w, gamma, beta, *, input_resolution, out_dtype=None):
    """x: (B, H*W, dim); w = expand.weight.T: (dim, 16*dim); gamma/beta: (dim,)."""
    H, W = input_resolution
    B, L, dim = x.shape
    assert L == H * W, "input feature has wrong size"
    C4 = 4 * dim
    C16 = 16 * dim
    assert w.shape == (dim, C16), "expected transposed expand weight (dim, 16*dim)"
    o_dtype = jnp.dtype(out_dtype) if out_dtype is not None else x.dtype

    x_b = x.dtype.itemsize
    w_b = w.dtype.itemsize
    o_b = o_dtype.itemsize

    # ---- weight strategy ---------------------------------------------------
    lane_ok = (C4 % 128 == 0)
    w_full_bytes = dim * C16 * w_b
    resident_w = lane_ok and (2 * w_full_bytes <= 8 * 1024 * 1024)
    if resident_w:
        # Hold the whole weight in VMEM; slice per-p1 inside the kernel.
        w_arg = w
        w_spec = pl.BlockSpec((dim, C16), lambda b, hi, p1: (0, 0))
        w_vmem = 2 * w_full_bytes
    elif lane_ok:
        # Stream a (dim, 4*dim) column block per p1 step, no wrapper transpose.
        w_arg = w
        w_spec = pl.BlockSpec((dim, C4), lambda b, hi, p1: (0, p1))
        w_vmem = 2 * dim * C4 * w_b
    else:
        # Fallback for non-lane-aligned 4*dim: pre-split the p1 axis once.
        w_arg = w.reshape(dim, 4, C4).transpose(1, 0, 2)        # (4, dim, 4*dim)
        w_spec = pl.BlockSpec((None, dim, C4), lambda b, hi, p1: (p1, 0, 0))
        w_vmem = 2 * dim * C4 * w_b

    # ---- tile sizing from actual chip VMEM ----------------------------------
    cap = _vmem_capacity_bytes()
    vmem_budget = int(0.70 * cap)
    fixed_vmem = w_vmem + (1 << 18)                    # weight + small constants
    # double-buffered x + out blocks, plus ~4 live f32 (n, 4*dim) temporaries.
    per_row = 2 * dim * x_b + 2 * C4 * o_b + 4 * C4 * 4
    max_rows = int(max(W, (vmem_budget - fixed_vmem) // per_row))

    th = _pick_h_tile(H, W, max_rows, full_rows_ok=(B == 1))
    n_hi = H // th
    blk_rows = th * W
    rows = B * L

    # ---- small constant operands --------------------------------------------
    x2 = x.reshape(rows, dim)
    g4 = jnp.tile(gamma.astype(jnp.float32), 4).reshape(1, C4)
    b4 = jnp.tile(beta.astype(jnp.float32), 4).reshape(1, C4)
    chunk_id = jnp.arange(C4, dtype=jnp.int32) // dim
    rmat = (chunk_id[:, None] == jnp.arange(NSTAT, dtype=jnp.int32)[None, :]
            ).astype(jnp.float32)                                  # (4*dim, NSTAT)
    bmat = rmat.T                                                  # (NSTAT, 4*dim)

    vmem_limit = int(0.72 * cap)                    # always set, chip-aware clamp

    w_read = w_full_bytes if resident_w else B * n_hi * 4 * dim * C4 * w_b
    cost = pl.CostEstimate(
        flops=int(2 * rows * dim * C16 + 32 * rows * C4),
        transcendentals=int(rows * 16),
        bytes_accessed=int(rows * dim * x_b + 16 * rows * dim * o_b + w_read),
    )

    kernel = functools.partial(_expand_norm_shuffle_kernel,
                               c4=C4, inv_dim=1.0 / dim, resident_w=resident_w)

    # Output laid out (B*H, p1, W, p2*c); the final reshape to (B, 16*H*W, dim)
    # is a free contiguous view.
    out4 = pl.pallas_call(
        kernel,
        out_shape=jax.ShapeDtypeStruct((B * H, 4, W, C4), o_dtype),
        grid_spec=pltpu.PrefetchScalarGridSpec(
            num_scalar_prefetch=0,
            grid=(B, n_hi, 4),
            in_specs=[
                pl.BlockSpec((blk_rows, dim),
                             lambda b, hi, p1: (b * n_hi + hi, 0)),
                w_spec,
                pl.BlockSpec((1, C4), lambda b, hi, p1: (0, 0)),
                pl.BlockSpec((1, C4), lambda b, hi, p1: (0, 0)),
                pl.BlockSpec((C4, NSTAT), lambda b, hi, p1: (0, 0)),
                pl.BlockSpec((NSTAT, C4), lambda b, hi, p1: (0, 0)),
            ],
            out_specs=pl.BlockSpec(
                (th, None, W, C4),
                lambda b, hi, p1: (b * n_hi + hi, p1, 0, 0)),
        ),
        compiler_params=pltpu.CompilerParams(
            dimension_semantics=("parallel", "parallel", "parallel"),
            vmem_limit_bytes=vmem_limit),
        cost_estimate=cost,
    )(x2, w_arg, g4, b4, rmat, bmat)

    return out4.reshape(B, 16 * H * W, dim)


def _reference(x, w, gamma, beta, input_resolution):
    """Plain-JAX replica of the PyTorch forward, for verification."""
    H, W = input_resolution
    B, L, dim = x.shape
    y = jnp.dot(x, w)                               # (B, L, 16*dim)
    y = y.reshape(B, H, W, 4, 4, dim)
    y = jnp.transpose(y, (0, 1, 3, 2, 4, 5)).reshape(B, 16 * H * W, dim)
    mean = jnp.mean(y, axis=-1, keepdims=True)
    var = jnp.mean((y - mean) ** 2, axis=-1, keepdims=True)
    return (y - mean) * lax.rsqrt(var + LN_EPS) * gamma + beta


if __name__ == "__main__":
    key = jax.random.PRNGKey(0)
    B, H, W, dim = 2, 8, 8, 32
    kx, kw, kg, kb = jax.random.split(key, 4)

    x = jax.random.normal(kx, (B, H * W, dim), dtype=jnp.float32)
    # nn.Linear(dim, 16*dim, bias=False): weight (16*dim, dim); we pass its
    # transpose (dim, 16*dim) so the kernel computes x @ W directly.
    w = (jax.random.normal(kw, (dim, 16 * dim), dtype=jnp.float32)
         * (1.0 / jnp.sqrt(dim)))
    # Non-trivial LayerNorm affine parameters to exercise gamma/beta paths.
    gamma = 1.0 + 0.1 * jax.random.normal(kg, (dim,), dtype=jnp.float32)
    beta = 0.1 * jax.random.normal(kb, (dim,), dtype=jnp.float32)

    out = final_patch_expand_x4(x, w, gamma, beta, input_resolution=(H, W))
    out = jax.block_until_ready(out)

    ref = _reference(x, w, gamma, beta, (H, W))
    assert out.shape == (B, 16 * H * W, dim), out.shape
    assert jnp.allclose(out, ref, atol=1e-4, rtol=1e-4), "mismatch vs reference"

    print("KERNEL_OK")
</pallas_src>

<mosaic_0001>
module attributes {stable_mosaic.version = 11 : i64} {
  func.func @_expand_norm_shuffle_kernel(%arg0: i32, %arg1: i32, %arg2: i32, %arg3: memref<64x32xf32, #tpu.memory_space<vmem>>, %arg4: memref<32x512xf32, #tpu.memory_space<vmem>>, %arg5: memref<1x128xf32, #tpu.memory_space<vmem>>, %arg6: memref<1x128xf32, #tpu.memory_space<vmem>>, %arg7: memref<128x8xf32, #tpu.memory_space<vmem>>, %arg8: memref<8x128xf32, #tpu.memory_space<vmem>>, %arg9: memref<8x1x8x128xf32, #tpu.memory_space<vmem>>) attributes {dimension_semantics = [#tpu.dimension_semantics<parallel>, #tpu.dimension_semantics<parallel>, #tpu.dimension_semantics<parallel>], iteration_bounds = array<i64: 2, 1, 4>, scalar_prefetch = 0 : i64, scratch_operands = 0 : i64, tpu.core_type = #tpu.core_type<tc>, window_params = [{transform_indices = @transform_0, window_bounds = array<i64: 64, 32>}, {pipeline_mode = #tpu.pipeline_mode<synchronous>, transform_indices = @transform_1, window_bounds = array<i64: 32, 512>}, {pipeline_mode = #tpu.pipeline_mode<synchronous>, transform_indices = @transform_2, window_bounds = array<i64: 1, 128>}, {pipeline_mode = #tpu.pipeline_mode<synchronous>, transform_indices = @transform_3, window_bounds = array<i64: 1, 128>}, {pipeline_mode = #tpu.pipeline_mode<synchronous>, transform_indices = @transform_4, window_bounds = array<i64: 128, 8>}, {pipeline_mode = #tpu.pipeline_mode<synchronous>, transform_indices = @transform_5, window_bounds = array<i64: 8, 128>}, {transform_indices = @transform_6, window_bounds = array<i64: 8, 1, 8, 128>}]} {
    %c128_i32 = arith.constant 128 : i32
    %0 = arith.muli %arg2, %c128_i32 : i32
    %1 = tpu.assume_multiple %0, 128 : i32
    %c0 = arith.constant 0 : index
    %2 = arith.index_cast %1 : i32 to index
    %3 = vector.load %arg4[%c0, %2] : memref<32x512xf32, #tpu.memory_space<vmem>>, vector<32x128xf32>
    %c0_0 = arith.constant 0 : index
    %c0_1 = arith.constant 0 : index
    %4 = vector.load %arg3[%c0_0, %c0_1] : memref<64x32xf32, #tpu.memory_space<vmem>>, vector<64x32xf32>
    %cst = arith.constant dense<0.000000e+00> : vector<64x128xf32>
    %5 = tpu.matmul %4, %3, %cst {dimension_numbers = #tpu.dot_dimension_numbers<[1], [0], [0], [1], [0, 0, 1, 1], [], []>} : vector<64x32xf32>, vector<32x128xf32>, vector<64x128xf32> -> vector<64x128xf32>
    %c0_2 = arith.constant 0 : index
    %c0_3 = arith.constant 0 : index
    %6 = vector.load %arg7[%c0_2, %c0_3] : memref<128x8xf32, #tpu.memory_space<vmem>>, vector<128x8xf32>
    %cst_4 = arith.constant dense<0.000000e+00> : vector<64x8xf32>
    %7 = tpu.matmul %5, %6, %cst_4 {dimension_numbers = #tpu.dot_dimension_numbers<[1], [0], [0], [1], [0, 0, 1, 1], [], []>} : vector<64x128xf32>, vector<128x8xf32>, vector<64x8xf32> -> vector<64x8xf32>
    %8 = arith.mulf %5, %5 : vector<64x128xf32>
    %c0_5 = arith.constant 0 : index
    %c0_6 = arith.constant 0 : index
    %9 = vector.load %arg7[%c0_5, %c0_6] : memref<128x8xf32, #tpu.memory_space<vmem>>, vector<128x8xf32>
    %cst_7 = arith.constant dense<0.000000e+00> : vector<64x8xf32>
    %10 = tpu.matmul %8, %9, %cst_7 {dimension_numbers = #tpu.dot_dimension_numbers<[1], [0], [0], [1], [0, 0, 1, 1], [], []>} : vector<64x128xf32>, vector<128x8xf32>, vector<64x8xf32> -> vector<64x8xf32>
    %cst_8 = arith.constant 3.125000e-02 : f32
    %11 = vector.broadcast %cst_8 : f32 to vector<64x8xf32>
    %12 = arith.mulf %7, %11 : vector<64x8xf32>
    %cst_9 = arith.constant 3.125000e-02 : f32
    %13 = vector.broadcast %cst_9 : f32 to vector<64x8xf32>
    %14 = arith.mulf %10, %13 : vector<64x8xf32>
    %15 = arith.mulf %12, %12 : vector<64x8xf32>
    %16 = arith.subf %14, %15 : vector<64x8xf32>
    %cst_10 = arith.constant 9.99999974E-6 : f32
    %17 = vector.broadcast %cst_10 : f32 to vector<64x8xf32>
    %18 = arith.addf %16, %17 : vector<64x8xf32>
    %19 = math.rsqrt %18 : vector<64x8xf32>
    %c0_11 = arith.constant 0 : index
    %c0_12 = arith.constant 0 : index
    %20 = vector.load %arg8[%c0_11, %c0_12] : memref<8x128xf32, #tpu.memory_space<vmem>>, vector<8x128xf32>
    %cst_13 = arith.constant dense<0.000000e+00> : vector<64x128xf32>
    %21 = tpu.matmul %12, %20, %cst_13 {dimension_numbers = #tpu.dot_dimension_numbers<[1], [0], [0], [1], [0, 0, 1, 1], [], []>} : vector<64x8xf32>, vector<8x128xf32>, vector<64x128xf32> -> vector<64x128xf32>
    %c0_14 = arith.constant 0 : index
    %c0_15 = arith.constant 0 : index
    %22 = vector.load %arg8[%c0_14, %c0_15] : memref<8x128xf32, #tpu.memory_space<vmem>>, vector<8x128xf32>
    %cst_16 = arith.constant dense<0.000000e+00> : vector<64x128xf32>
    %23 = tpu.matmul %19, %22, %cst_16 {dimension_numbers = #tpu.dot_dimension_numbers<[1], [0], [0], [1], [0, 0, 1, 1], [], []>} : vector<64x8xf32>, vector<8x128xf32>, vector<64x128xf32> -> vector<64x128xf32>
    %24 = arith.subf %5, %21 : vector<64x128xf32>
    %c0_17 = arith.constant 0 : index
    %c0_18 = arith.constant 0 : index
    %25 = vector.load %arg5[%c0_17, %c0_18] : memref<1x128xf32, #tpu.memory_space<vmem>>, vector<1x128xf32>
    %26 = vector.broadcast %25 : vector<1x128xf32> to vector<64x128xf32>
    %27 = arith.mulf %23, %26 : vector<64x128xf32>
    %28 = arith.mulf %24, %27 : vector<64x128xf32>
    %c0_19 = arith.constant 0 : index
    %c0_20 = arith.constant 0 : index
    %29 = vector.load %arg6[%c0_19, %c0_20] : memref<1x128xf32, #tpu.memory_space<vmem>>, vector<1x128xf32>
    %30 = vector.broadcast %29 : vector<1x128xf32> to vector<64x128xf32>
    %31 = arith.addf %28, %30 : vector<64x128xf32>
    %32 = vector.shape_cast %31 : vector<64x128xf32> to vector<8x8x128xf32>
    %c0_21 = arith.constant 0 : index
    %c0_22 = arith.constant 0 : index
    %c0_23 = arith.constant 0 : index
    %c0_24 = arith.constant 0 : index
    %33 = vector.load %arg9[%c0_21, %c0_22, %c0_23, %c0_24] : memref<8x1x8x128xf32, #tpu.memory_space<vmem>>, vector<8x1x8x128xf32>
    %34 = vector.shape_cast %33 : vector<8x1x8x128xf32> to vector<8x8x128xf32>
    %35 = vector.shape_cast %32 : vector<8x8x128xf32> to vector<8x1x8x128xf32>
    tpu.vector_store %arg9[%c0_21, %c0_22, %c0_23, %c0_24], %35 {strides = array<i32>} : memref<8x1x8x128xf32, #tpu.memory_space<vmem>>, vector<8x1x8x128xf32>,
    return
  }
  func.func @transform_0(%arg0: i32, %arg1: i32, %arg2: i32) -> (i32, i32) {
    %c1_i32 = arith.constant 1 : i32
    %0 = arith.muli %arg0, %c1_i32 : i32
    %1 = arith.addi %0, %arg1 : i32
    %c0_i32 = arith.constant 0 : i32
    %c0_i32_0 = arith.constant 0 : i32
    return %1, %c0_i32 : i32, i32
  }
  func.func @transform_1(%arg0: i32, %arg1: i32, %arg2: i32) -> (i32, i32) {
    %c0_i32 = arith.constant 0 : i32
    %c0_i32_0 = arith.constant 0 : i32
    %c0_i32_1 = arith.constant 0 : i32
    return %c0_i32, %c0_i32_0 : i32, i32
  }
  func.func @transform_2(%arg0: i32, %arg1: i32, %arg2: i32) -> (i32, i32) {
    %c0_i32 = arith.constant 0 : i32
    %c0_i32_0 = arith.constant 0 : i32
    %c0_i32_1 = arith.constant 0 : i32
    return %c0_i32, %c0_i32_0 : i32, i32
  }
  func.func @transform_3(%arg0: i32, %arg1: i32, %arg2: i32) -> (i32, i32) {
    %c0_i32 = arith.constant 0 : i32
    %c0_i32_0 = arith.constant 0 : i32
    %c0_i32_1 = arith.constant 0 : i32
    return %c0_i32, %c0_i32_0 : i32, i32
  }
  func.func @transform_4(%arg0: i32, %arg1: i32, %arg2: i32) -> (i32, i32) {
    %c0_i32 = arith.constant 0 : i32
    %c0_i32_0 = arith.constant 0 : i32
    %c0_i32_1 = arith.constant 0 : i32
    return %c0_i32, %c0_i32_0 : i32, i32
  }
  func.func @transform_5(%arg0: i32, %arg1: i32, %arg2: i32) -> (i32, i32) {
    %c0_i32 = arith.constant 0 : i32
    %c0_i32_0 = arith.constant 0 : i32
    %c0_i32_1 = arith.constant 0 : i32
    return %c0_i32, %c0_i32_0 : i32, i32
  }
  func.func @transform_6(%arg0: i32, %arg1: i32, %arg2: i32) -> (i32, i32, i32, i32) {
    %c1_i32 = arith.constant 1 : i32
    %0 = arith.muli %arg0, %c1_i32 : i32
    %1 = arith.addi %0, %arg1 : i32
    %c0_i32 = arith.constant 0 : i32
    %c0_i32_0 = arith.constant 0 : i32
    %c0_i32_1 = arith.constant 0 : i32
    return %1, %arg2, %c0_i32, %c0_i32_0 : i32, i32, i32, i32
  }
}

</mosaic_0001>

<bundles_post_ra>
// kernel: tile.13
= control target key start
LH: loop header
LB: loop body
LE: loop exit
PB: predicated region body
PF: predicated region fallthrough
CT: control target
= control target key end

     0   :  { %s22_s0 = inlined_call_operand.vmem [shape: f32[32], index: 0, kind: input, shape index: {}]   ;;  %s23_s1 = inlined_call_operand.vmem [shape: f32[4,32], index: 1, kind: output, shape index: {}]  }
   0x1   :  { %v4_v0 = vld [vmem:[%s22_s0] ss:$0 sm:$0xff] }
   0x2   :  { %5 = vst [vmem:[%s23_s1] sm:$0xf] %v4_v0 }

// kernel: tile.14
= control target key start
LH: loop header
LB: loop body
LE: loop exit
PB: predicated region body
PF: predicated region fallthrough
CT: control target
= control target key end

     0   :  { %vm7_vm0 = vcmask 261120   ;;  %s37_s8 = smov 32   ;;  %s38_s9 = smov 64   ;;  %vm13_vm1 = vcmask 1048320   ;;  %vm19_vm2 = vcmask 785920   ;;  %vm25_vm3 = vcmask 523520   ;;  %s55_s0 = inlined_call_operand.vmem [shape: f32[4,32], index: 0, kind: input, shape index: {}]   ;;  %s56_s1 = inlined_call_operand.vmem [shape: f32[1,128], index: 1, kind: output, shape index: {}]  }
   0x1   :  { %v4_v0 = vld [vmem:[%s55_s0] sm:$0xf]  ;;  %s36_s0 = smov 96  }
   0x2   :  { %5 = vst [vmem:[#allocation1] sm:$0xf] %v4_v0 }
   0x9   :  { %v10_v1 = vld [vmem:[#allocation1 + $0x3] sm:$0x1]   ;;  %v22_v2 = vld [vmem:[#allocation1 + $0x1] sm:$0x1]   ;;  %v6_v3 = vld [vmem:[#allocation1] sm:$0x1]  }
   0xa   :  { %11 = vrot.lane.b32.xlu0 %v10_v1, %s36_s0  ;;  %23 = vrot.lane.b32.xlu1 %v22_v2, %s37_s8  ;;  %v16_v4 = vld [vmem:[#allocation1 + $0x2] sm:$0x1]   ;;  %8 = vst.msk [vmem:[#allocation0] sm:$0x1] %vm7_vm0, %v6_v3  }
   0xe   :  { %17 = vrot.lane.b32.xlu0 %v16_v4, %s38_s9 }
  0x7c   :  { %v12_v5 = vpop.permute.xlu0 %11   ;;  %v24_v6 = vpop.permute.xlu1 %23  }
  0x7d   :  { %14 = vst.msk [vmem:[#allocation0] sm:$0x1] %vm13_vm1, %v12_v5  }
  0x80   :  { %v18_v7 = vpop.permute.xlu0 %17  }
  0x81   :  { %20 = vst.msk [vmem:[#allocation0] sm:$0x1] %vm19_vm2, %v18_v7  }
  0x82   :  { %26 = vst.msk [vmem:[#allocation0] sm:$0x1] %vm25_vm3, %v24_v6  }
  0x89   :  { %v30_v8 = vld [vmem:[#allocation0] sm:$0x1] }
  0x8a   :  { %32 = vst [vmem:[%s56_s1] sm:$0x1] %v30_v8 }

// kernel: final_patch_expand_x4.1
= control target key start
LH: loop header
LB: loop body
LE: loop exit
PB: predicated region body
PF: predicated region fallthrough
CT: control target
= control target key end

     0   :  { %s1660_s21 = smov 0   ;;  %s1662_s22 = smov 0   ;;  %s1913_s0 = inlined_call_operand.vmem [shape: f32[128,32], index: 0, kind: input, shape index: {}]   ;;  %s1914_s1 = inlined_call_operand.vmem [shape: f32[32,512], index: 1, kind: input, shape index: {}]   ;;  %s1915_s2 = inlined_call_operand.vmem [shape: f32[1,128], index: 2, kind: input, shape index: {}]   ;;  %s1916_s3 = inlined_call_operand.vmem [shape: f32[1,128], index: 3, kind: input, shape index: {}]   ;;  %s1917_s4 = inlined_call_operand.vmem [shape: f32[128,8], index: 4, kind: input, shape index: {}]   ;;  %s1918_s5 = inlined_call_operand.vmem [shape: f32[8,128], index: 5, kind: input, shape index: {}]   ;;  %s1919_s6 = inlined_call_operand.vmem [shape: f32[16,4,8,128], index: 6, kind: output, shape index: {}]  }
   0x1   :  { %s1664_s23 = smov 0   ;;  %s1666_s24 = smov 0  }
   0x2   :  { %s1668_s25 = smov 0   ;;  %s1670_s26 = smov 0  }
   0x3   :  { %s1672_s27 = smov 0  }
   0x4 LB: > { %s28_s28 = sadd.s32 1, %s1615_s25  ;;  %s35_s29 = sadd.s32 1, %s1619_s26  ;;  %s1623_s27 = sphi %s1672_s27, %s16_s27   ;;  %s1619_s26 = sphi %s1670_s26, %s1926_s26   ;;  %s1615_s25 = sphi %s1668_s25, %s1925_s25   ;;  %s1611_s24 = sphi %s1666_s24, %s1924_s24   ;;  %s1607_s23 = sphi %s1664_s23, %s1923_s23   ;;  %s1603_s22 = sphi %s1662_s22, %s1922_s22   ;;  %s1599_s21 = sphi %s1660_s21, %s1921_s21  }
   0x5   : > { %p29_p0 = scmp.ge.s32.totalorder %s28_s28, 4  ;;  %s1166_s30 = sadd.s32 4294967295, %s1623_s27  }
   0x6   : > { %p189_p1 = scmp.ne.s32.totalorder %s1603_s22, %s1599_s21  ;;  %p190_p2 = scmp.eq.s32.totalorder %s1166_s30, 7 }
   0x7   : > { %s1928_s28 = smov (%p29_p0, %s28_s28), 0  ;;  %s1930_s29 = smov (!%p29_p0, %s35_s29), %s1619_s26 }
   0x8   : > { %s175_s7 = ssub.s32 %s1615_s25, %s1928_s28  ;;  %p37_p3 = scmp.ge.s32.totalorder %s1930_s29, 2 }
   0x9   : > { %p1170_p4 = scmp.ge.s32.totalorder %s1623_s27, 1  ;;  %p1706_p5 = por %p190_p2, %p189_p1 }
   0xa   : > { %p240_p6 = scmp.lt.s32.totalorder %s1623_s27, 9  ;;  %s1932_s29 = smov (%p37_p3, %s1930_s29), 0 }
   0xb   : > { %s174_s9 = ssub.s32 %s1619_s26, %s1932_s29  ;;  %s179_s11 = sadd.s32 1, %s1603_s22 }
   0xc   : > { %p241_p7 = pnand %p1170_p4, %p240_p6  ;;  %s176_s10 = sor.u32 %s175_s7, %s174_s9 }
   0xd   : > { %p177_p8 = scmp.eq.s32.totalorder %s176_s10, 0  ;;  %s1174_s13 = sshll.u32 (!%p241_p7), %s1607_s23, 7  ;;  %v427_v0 = vld [vmem:[%s1917_s4] sm:$0xff] (!%p241_p7)  ;;  %v428_v1 = vld [vmem:[%s1917_s4 + $0x8] sm:$0xff] (!%p241_p7)  ;;  %v429_v2 = vld [vmem:[%s1917_s4 + $0x10] sm:$0xff] (!%p241_p7)  ;;  %vm297_vm0 = vcmask (!%p241_p7), 261120  }
   0xe   : > { %244 = sbr.rel (%p241_p7) target bundleno = 718 (0x2ce), region = 44  ;;  %s1172_s14 = sshll.u32 (!%p241_p7), %s1611_s24, 3  ;;  %v1431_v3 = vpack.c.bf16 (!%p241_p7), %v428_v1, %v427_v0  ;;  %v430_v4 = vld [vmem:[%s1917_s4 + $0x18] sm:$0xff] (!%p241_p7)  ;;  %v431_v6 = vld [vmem:[%s1917_s4 + $0x20] sm:$0xff] (!%p241_p7)  ;;  %v432_v7 = vld [vmem:[%s1917_s4 + $0x28] sm:$0xff] (!%p241_p7)  ;;  %vm710_vm1 = vcmask (!%p241_p7), 64512  }
   0xf   : > { %s1717_s12 = scalar_select %p177_p8, %s1603_s22, %s179_s11  }
  0x10   : > { %s281_s30 = sshra.s32 (!%p241_p7), %s1174_s13, 7  ;;  %p272_p9 = scmp.lt.s32.totalorder (!%p241_p7), %s1172_s14, 15  ;;  %v1435_v5 = vpack.c.bf16 (!%p241_p7), %v430_v4, %v429_v2  ;;  %1432 = vmatprep.subr.bf16.mxu1 (!%p241_p7), %v1431_v3  ;;  %v1439_v14 = vpack.c.bf16 (!%p241_p7), %v432_v7, %v431_v6  ;;  %v433_v15 = vld [vmem:[%s1917_s4 + $0x30] sm:$0xff] (!%p241_p7)  ;;  %v434_v16 = vld [vmem:[%s1917_s4 + $0x38] sm:$0xff] (!%p241_p7)  ;;  %v435_v19 = vld [vmem:[%s1917_s4 + $0x40] sm:$0xff] (!%p241_p7) }
  0x11   : > { %s1175_s10 = sshll.u32 (!%p241_p7), %s281_s30, 3  ;;  %1434 = vmatpush3.bf16.msra.mxu1 (!%p241_p7), %v1431_v3  ;;  %v1443_v18 = vpack.c.bf16 (!%p241_p7), %v434_v16, %v433_v15  ;;  %v436_v20 = vld [vmem:[%s1917_s4 + $0x48] sm:$0xff] (!%p241_p7)  ;;  %v437_v24 = vld [vmem:[%s1917_s4 + $0x50] sm:$0xff] (!%p241_p7)  ;;  %v438_v25 = vld [vmem:[%s1917_s4 + $0x58] sm:$0xff] (!%p241_p7) }
  0x12   : > { %s284_s16 = scalar_lea.vmem (!%p241_p7), %s1914_s1, %s1175_s10  ;;  %1436 = vmatprep.subr.bf16.mxu1 (!%p241_p7), %v1435_v5  ;;  %v1447_v23 = vpack.c.bf16 (!%p241_p7), %v436_v20, %v435_v19  ;;  %v1451_v28 = vpack.c.bf16 (!%p241_p7), %v438_v25, %v437_v24  ;;  %v439_v29 = vld [vmem:[%s1917_s4 + $0x60] sm:$0xff] (!%p241_p7)  ;;  %v440_v30 = vld [vmem:[%s1917_s4 + $0x68] sm:$0xff] (!%p241_p7)  ;;  %v441_v34 = vld [vmem:[%s1917_s4 + $0x70] sm:$0xff] (!%p241_p7) }
  0x13   : > { %v285_v8 = vld [vmem:[%s284_s16] sm:$0xff] (!%p241_p7)  ;;  %v1455_v33 = vpack.c.bf16 (!%p241_p7), %v440_v30, %v439_v29  ;;  %v442_v35 = vld [vmem:[%s1917_s4 + $0x78] sm:$0xff] (!%p241_p7) }
  0x14   : > { %v286_v9 = vld [vmem:[%s284_s16 + $0x20] sm:$0xff] (!%p241_p7)  ;;  %v1459_v37 = vpack.c.bf16 (!%p241_p7), %v442_v35, %v441_v34 }
  0x15   : > { %v287_v10 = vld [vmem:[%s284_s16 + $0x40] sm:$0xff]  ;;  %s1934_s14 = smov (!%p272_p9, %s1172_s14), 15  ;;  %v1423_v11 = vpack.c.bf16 %v286_v9, %v285_v8  ;;  %1438 = vmatpush3.bf16.msra.mxu1 %v1435_v5  ;;  %s1208_s15 = sshll.u32 (%p1706_p5), %s1611_s24, 5 }
  0x16   : > { %v288_v12 = vld [vmem:[%s284_s16 + $0x60] sm:$0xff]  ;;  %s1173_s13 = sshll.u32 %s1934_s14, 3  ;;  %1440 = vmatprep.subr.bf16.mxu1 %v1439_v14  ;;  %s1033_s14 = sadd.s32 (%p1706_p5), %s1607_s23, %s1208_s15 }
  0x17   : > { %v1427_v13 = vpack.c.bf16 %v288_v12, %v287_v10  ;;  %1424 = vmatprep.subr.bf16.mxu0 %v1423_v11  ;;  %s1751_s17 = scalar_lea.vmem %s1913_s0, %s1173_s13  ;;  %v709_v54 = vld [vmem:[%s1918_s5] sm:$0xff]  ;;  %s267_s13 = sand.u32 1, %s1599_s21  }
  0x18   : > { %1426 = vmatpush3.bf16.msra.mxu0 %v1423_v11  ;;  %v289_v17 = vld [vmem:[%s1751_s17] sm:$0xff]  ;;  %v290_v21 = vld [vmem:[%s1751_s17 + $0x8] sm:$0xff]  ;;  %v291_v22 = vld [vmem:[%s1751_s17 + $0x10] sm:$0xff]  ;;  %s1171_s9 = sshll.u32 %s267_s13, 6  ;;  %s1205_s8 = sshll.u32 (%p1706_p5), %s1033_s14, 3 }
  0x19   : > { %1428 = vmatprep.subr.bf16.mxu0 %v1427_v13  ;;  %1295 = vmatprep.mubr.msk.f32.mxu0 %vm297_vm0, %v289_v17  ;;  %v292_v26 = vld [vmem:[%s1751_s17 + $0x18] sm:$0xff]  ;;  %v293_v27 = vld [vmem:[%s1751_s17 + $0x20] sm:$0xff]  ;;  %v294_v31 = vld [vmem:[%s1751_s17 + $0x28] sm:$0xff]  ;;  %s1867_s21 = scalar_lea.vmem [#allocation2], %s1171_s9  ;;  %s1035_s19 = scalar_lea.vmem (%p1706_p5), %s1919_s6, %s1205_s8 }
  0x1a   : > { %1442 = vmatpush3.bf16.msra.mxu1 %v1439_v14  ;;  %v295_v32 = vld [vmem:[%s1751_s17 + $0x30] sm:$0xff]  ;;  %v296_v36 = vld [vmem:[%s1751_s17 + $0x38] sm:$0xff] }
  0x1b   : > { %1444 = vmatprep.subr.bf16.mxu1 %v1443_v18 }
  0x1c   : > { %1430 = vmatpush3.bf16.msra.mxu0 %v1427_v13 }
  0x1d   : > { %1464 = vmatprep.subr.bf16.mxu0 %v1431_v3 }
  0x1e   : > { %1446 = vmatpush3.bf16.msra.mxu1 %v1443_v18 }
  0x1f   : > { %1296 = vmatmul.mubr.msk.f32.vlgmr.msra.gmra.mrb[0].mxu0 %vm297_vm0, %v290_v21  ;;  %1448 = vmatprep.subr.bf16.mxu1 %v1447_v23 }
  0x20   : > { %1298 = vmatprep.mubr.msk.f32.mxu0 %vm297_vm0, %v291_v22  ;;  %1466 = vmatpush3.bf16.msra.mxu0 %v1431_v3 }
  0x21   : > { %1468 = vmatprep.subr.bf16.mxu0 %v1435_v5 }
  0x22   : > { %1450 = vmatpush3.bf16.msra.mxu1 %v1447_v23 }
  0x23   : > { %1299 = vmatmul.mubr.msk.f32.gmra.mrb[2].mxu0 %vm297_vm0, %v292_v26  ;;  %1452 = vmatprep.subr.bf16.mxu1 %v1451_v28 }
  0x24   : > { %1301 = vmatprep.mubr.msk.f32.mxu0 %vm297_vm0, %v293_v27  ;;  %1470 = vmatpush3.bf16.msra.mxu0 %v1435_v5 }
  0x25   : > { %1472 = vmatprep.subr.bf16.mxu0 %v1439_v14 }
  0x26   : > { %1454 = vmatpush3.bf16.msra.mxu1 %v1451_v28 }
  0x27   : > { %1302 = vmatmul.mubr.msk.f32.gmra.mrb[4].mxu0 %vm297_vm0, %v294_v31  ;;  %1456 = vmatprep.subr.bf16.mxu1 %v1455_v33 }
  0x28   : > { %1304 = vmatprep.mubr.msk.f32.mxu0 %vm297_vm0, %v295_v32  ;;  %1474 = vmatpush3.bf16.msra.mxu0 %v1439_v14 }
  0x29   : > { %1476 = vmatprep.subr.bf16.mxu0 %v1443_v18 }
  0x2a   : > { %1458 = vmatpush3.bf16.msra.mxu1 %v1455_v33 }
  0x2b   : > { %1305 = vmatmul.mubr.msk.f32.gmra.mrb[6].mxu0 %vm297_vm0, %v296_v36  ;;  %1460 = vmatprep.subr.bf16.mxu1 %v1459_v37 }
  0x2c   : > { %1478 = vmatpush3.bf16.msra.mxu0 %v1443_v18 }
  0x2d   : > { %1480 = vmatprep.subr.bf16.mxu0 %v1447_v23 }
  0x2e   : > { %1462 = vmatpush3.bf16.msra.mxu1 %v1459_v37 }
  0x2f   : > { %1395 = vmatprep.subr.mxu1 %v709_v54 }
  0x30   : > { %1482 = vmatpush3.bf16.msra.mxu0 %v1447_v23 }
  0x31   : > { %1484 = vmatprep.subr.bf16.mxu0 %v1451_v28 }
  0x34   : > { %1486 = vmatpush3.bf16.msra.mxu0 %v1451_v28 }
  0x35   : > { %1488 = vmatprep.subr.bf16.mxu0 %v1455_v33 }
  0x38   : > { %1490 = vmatpush3.bf16.msra.mxu0 %v1455_v33 }
  0x39   : > { %1492 = vmatprep.subr.bf16.mxu0 %v1459_v37 }
  0x3c   : > { %1494 = vmatpush3.bf16.msra.mxu0 %v1459_v37 }
  0x3d   : > { %1409 = vmatprep.subr.mxu0 %v709_v54 }
  0xf2   : > { %v1793_v38 = vpop.f32.mrb[0].mxu0 }
  0xf3   : > { %v1795_v39 = vpop.f32.mrb[1].mxu0  ;;  %v549_v41 = vmul.f32 %v1793_v38, %v1793_v38 }
  0xf4   : > { %v548_v40 = vmul.f32 %v1795_v39, %v1795_v39  ;;  %1339 = vmatprep.mubr.f32.mxu1 %v1795_v39 }
  0xf5   : > { %1340 = vmatmul.mubr.f32.vlgmr.msra.gmra.mrb[0].mxu1 %v1793_v38 }
  0xf6   : > { %v1803_v42 = vpop.f32.mrb[2].mxu0  ;;  %1383 = vmatprep.mubr.f32.mxu0 %v548_v40  ;;  %1396 = vmatpush3.msra.mxu1 %v709_v54 }
  0xf7   : > { %v1805_v43 = vpop.f32.mrb[3].mxu0  ;;  %1384 = vmatmul.mubr.f32.vlgmr.msra.gmra.mrb[8].mxu0 %v549_v41  ;;  %v551_v45 = vmul.f32 %v1803_v42, %v1803_v42  ;;  %1495 = vmatprep.subr.mxu1 %v709_v54 }
  0xf8   : > { %v550_v44 = vmul.f32 %v1805_v43, %v1805_v43  ;;  %1342 = vmatprep.mubr.f32.mxu1 %v1805_v43  ;;  %1410 = vmatpush3.msra.mxu0 %v709_v54 }
  0xf9   : > { %1343 = vmatmul.mubr.f32.gmra.mrb[2].mxu1 %v1803_v42 }
  0xfa   : > { %v1813_v46 = vpop.f32.mrb[4].mxu0  ;;  %1386 = vmatprep.mubr.f32.mxu0 %v550_v44 }
  0xfb   : > { %v1815_v47 = vpop.f32.mrb[5].mxu0  ;;  %1387 = vmatmul.mubr.f32.gmra.mrb[10].mxu0 %v551_v45  ;;  %v553_v49 = vmul.f32 %v1813_v46, %v1813_v46 }
  0xfc   : > { %v552_v48 = vmul.f32 %v1815_v47, %v1815_v47  ;;  %1345 = vmatprep.mubr.f32.mxu1 %v1815_v47 }
  0xfd   : > { %1346 = vmatmul.mubr.f32.gmra.mrb[4].mxu1 %v1813_v46 }
  0xfe   : > { %v1823_v50 = vpop.f32.mrb[6].mxu0  ;;  %1389 = vmatprep.mubr.f32.mxu0 %v552_v48 }
  0xff   : > { %v1825_v51 = vpop.f32.mrb[7].mxu0  ;;  %1390 = vmatmul.mubr.f32.gmra.mrb[12].mxu0 %v553_v49  ;;  %v555_v53 = vmul.f32 %v1823_v50, %v1823_v50 }
 0x100   : > { %v554_v52 = vmul.f32 %v1825_v51, %v1825_v51  ;;  %1348 = vmatprep.mubr.f32.mxu1 %v1825_v51 }
 0x101   : > { %1349 = vmatmul.mubr.f32.gmra.mrb[6].mxu1 %v1823_v50 }
 0x102   : > { %1392 = vmatprep.mubr.f32.mxu0 %v554_v52 }
 0x103   : > { %1393 = vmatmul.mubr.f32.gmra.mrb[14].mxu0 %v555_v53 }
 0x1c8   : > { %v1341_v55 = vpop.f32.mrb[0].mxu1 }
 0x1c9   : > { %v662_v56 = vmul.f32 0.03125, %v1341_v55  ;;  %v509_v57 = vpop.f32.mrb[1].mxu1 }
 0x1ca   : > { %v661_v58 = vmul.f32 0.03125, %v509_v57  ;;  %v1385_v59 = vpop.f32.mrb[8].mxu0 }
 0x1cb   : > { %v678_v60 = vmul.f32 %v662_v56, %v662_v56  ;;  %v670_v61 = vmul.f32 0.03125, %v1385_v59  ;;  %v622_v62 = vpop.f32.mrb[9].mxu0 }
 0x1cc   : > { %v677_v63 = vmul.f32 %v661_v58, %v661_v58  ;;  %v669_v0 = vmul.f32 0.03125, %v622_v62  ;;  %v1344_v1 = vpop.f32.mrb[2].mxu1  ;;  %1397 = vmatprep.mubr.msk.f32.mxu1 %vm710_vm1, %v661_v58 }
 0x1cd   : > { %v686_v2 = vsub.f32 %v670_v61, %v678_v60  ;;  %v664_v3 = vmul.f32 0.03125, %v1344_v1  ;;  %v519_v4 = vpop.f32.mrb[3].mxu1  ;;  %1398 = vmatmul.mubr.msk.f32.vlgmr.msra.gmra.mrb[8].mxu1 %vm710_vm1, %v662_v56 }
 0x1ce   : > { %v685_v5 = vsub.f32 %v669_v0, %v677_v63  ;;  %v663_v6 = vmul.f32 0.03125, %v519_v4  ;;  %v1388_v7 = vpop.f32.mrb[10].mxu0  ;;  %1496 = vmatpush3.msra.mxu1 %v709_v54 }
 0x1cf   : > { %v694_v8 = vadd.f32 1e-05, %v686_v2  ;;  %v680_v9 = vmul.f32 %v664_v3, %v664_v3  ;;  %v672_v10 = vmul.f32 0.03125, %v1388_v7  ;;  %v632_v11 = vpop.f32.mrb[11].mxu0 }
 0x1d0   : > { %v693_v12 = vadd.f32 1e-05, %v685_v5  ;;  %v679_v13 = vmul.f32 %v663_v6, %v663_v6  ;;  %v671_v14 = vmul.f32 0.03125, %v632_v11  ;;  %v1347_v15 = vpop.f32.mrb[4].mxu1  ;;  %1400 = vmatprep.mubr.msk.f32.mxu1 %vm710_vm1, %v663_v6 }
 0x1d1   : > { %v688_v16 = vsub.f32 %v672_v10, %v680_v9  ;;  %v666_v17 = vmul.f32 0.03125, %v1347_v15  ;;  %v529_v18 = vpop.f32.mrb[5].mxu1  ;;  %1401 = vmatmul.mubr.msk.f32.gmra.mrb[10].mxu1 %vm710_vm1, %v664_v3 }
 0x1d2   : > { %1553 = vrsqrt.f32 %v693_v12  ;;  %v687_v19 = vsub.f32 %v671_v14, %v679_v13  ;;  %v665_v20 = vmul.f32 0.03125, %v529_v18  ;;  %v1391_v21 = vpop.f32.mrb[12].mxu0 }
 0x1d3   : > { %1555 = vrsqrt.f32 %v694_v8  ;;  %v696_v22 = vadd.f32 1e-05, %v688_v16  ;;  %v682_v23 = vmul.f32 %v666_v17, %v666_v17  ;;  %v674_v24 = vmul.f32 0.03125, %v1391_v21  ;;  %v642_v25 = vpop.f32.mrb[13].mxu0 }
 0x1d4   : > { %v695_v26 = vadd.f32 1e-05, %v687_v19  ;;  %v681_v27 = vmul.f32 %v665_v20, %v665_v20  ;;  %v673_v28 = vmul.f32 0.03125, %v642_v25  ;;  %v1350_v29 = vpop.f32.mrb[6].mxu1  ;;  %1403 = vmatprep.mubr.msk.f32.mxu1 %vm710_vm1, %v665_v20 }
 0x1d5   : > { %v690_v30 = vsub.f32 %v674_v24, %v682_v23  ;;  %v668_v31 = vmul.f32 0.03125, %v1350_v29  ;;  %v539_v32 = vpop.f32.mrb[7].mxu1  ;;  %1404 = vmatmul.mubr.msk.f32.gmra.mrb[12].mxu1 %vm710_vm1, %v666_v17 }
 0x1d6   : > { %1557 = vrsqrt.f32 %v695_v26  ;;  %v689_v33 = vsub.f32 %v673_v28, %v681_v27  ;;  %v667_v34 = vmul.f32 0.03125, %v539_v32  ;;  %v1394_v35 = vpop.f32.mrb[14].mxu0 }
 0x1d7   : > { %1559 = vrsqrt.f32 %v696_v22  ;;  %v698_v36 = vadd.f32 1e-05, %v690_v30  ;;  %v684_v37 = vmul.f32 %v668_v31, %v668_v31  ;;  %v676_v40 = vmul.f32 0.03125, %v1394_v35  ;;  %v652_v41 = vpop.f32.mrb[15].mxu0 }
 0x1d8   : > { %v697_v44 = vadd.f32 1e-05, %v689_v33  ;;  %v683_v45 = vmul.f32 %v667_v34, %v667_v34  ;;  %v675_v48 = vmul.f32 0.03125, %v652_v41  ;;  %1406 = vmatprep.mubr.msk.f32.mxu1 %vm710_vm1, %v667_v34 }
 0x1d9   : > { %v692_v49 = vsub.f32 %v676_v40, %v684_v37  ;;  %1407 = vmatmul.mubr.msk.f32.gmra.mrb[14].mxu1 %vm710_vm1, %v668_v31 }
 0x1da   : > { %1561 = vrsqrt.f32 %v697_v44  ;;  %v691_v52 = vsub.f32 %v675_v48, %v683_v45 }
 0x1db   : > { %1563 = vrsqrt.f32 %v698_v36  ;;  %v700_v53 = vadd.f32 1e-05, %v692_v49 }
 0x1dc   : > { %v1554_v54 = vpop.eup %1553  ;;  %v699_v55 = vadd.f32 1e-05, %v691_v52 }
 0x1dd   : > { %v1556_v56 = vpop.eup %1555  ;;  %1411 = vmatprep.mubr.msk.f32.mxu0 %vm710_vm1, %v1554_v54 }
 0x1de   : > { %1565 = vrsqrt.f32 %v699_v55  ;;  %1412 = vmatmul.mubr.msk.f32.vlgmr.msra.gmra.mrb[16].mxu0 %vm710_vm1, %v1556_v56 }
 0x1df   : > { %1567 = vrsqrt.f32 %v700_v53 }
 0x1e0   : > { %v1558_v57 = vpop.eup %1557 }
 0x1e1   : > { %v1560_v58 = vpop.eup %1559  ;;  %1414 = vmatprep.mubr.msk.f32.mxu0 %vm710_vm1, %v1558_v57 }
 0x1e2   : > { %1415 = vmatmul.mubr.msk.f32.gmra.mrb[18].mxu0 %vm710_vm1, %v1560_v58 }
 0x1e4   : > { %v1562_v59 = vpop.eup %1561 }
 0x1e5   : > { %v1564_v60 = vpop.eup %1563  ;;  %1417 = vmatprep.mubr.msk.f32.mxu0 %vm710_vm1, %v1562_v59 }
 0x1e6   : > { %1418 = vmatmul.mubr.msk.f32.gmra.mrb[20].mxu0 %vm710_vm1, %v1564_v60 }
 0x1e8   : > { %v1566_v61 = vpop.eup %1565 }
 0x1e9   : > { %v1568_v62 = vpop.eup %1567  ;;  %1420 = vmatprep.mubr.msk.f32.mxu1 %vm710_vm1, %v1566_v61 }
 0x1ea   : > { %1421 = vmatmul.mubr.msk.f32.vlgmr.msra.gmra.mrb[16].mxu1 %vm710_vm1, %v1568_v62 }
 0x2a0   : > { %v1399_v63 = vpop.f32.mrb[8].mxu1 }
 0x2a1   : > { %v970_v0 = vsub.f32 %v1793_v38, %v1399_v63  ;;  %v801_v1 = vpop.f32.mrb[9].mxu1 }
 0x2a2   : > { %v969_v2 = vsub.f32 %v1795_v39, %v801_v1  ;;  %v1200_v39 = vld [vmem:[%s1915_s2] ss:$0 sm:$0xff] }
 0x2a4   : > { %v1402_v3 = vpop.f32.mrb[10].mxu1 }
 0x2a5   : > { %v972_v4 = vsub.f32 %v1803_v42, %v1402_v3  ;;  %v811_v5 = vpop.f32.mrb[11].mxu1 }
 0x2a6   : > { %v971_v6 = vsub.f32 %v1805_v43, %v811_v5 }
 0x2a8   : > { %v1405_v7 = vpop.f32.mrb[12].mxu1 }
 0x2a9   : > { %v974_v8 = vsub.f32 %v1813_v46, %v1405_v7  ;;  %v821_v9 = vpop.f32.mrb[13].mxu1  ;;  %v1201_v46 = vld [vmem:[%s1916_s3] ss:$0 sm:$0xff] }
 0x2aa   : > { %v973_v10 = vsub.f32 %v1815_v47, %v821_v9 }
 0x2ac   : > { %v1408_v11 = vpop.f32.mrb[14].mxu1 }
 0x2ad   : > { %v976_v12 = vsub.f32 %v1823_v50, %v1408_v11  ;;  %v831_v13 = vpop.f32.mrb[15].mxu1 }
 0x2ae   : > { %v975_v38 = vsub.f32 %v1825_v51, %v831_v13 }
 0x2b1   : > { %v1413_v42 = vpop.f32.mrb[16].mxu0 }
 0x2b2   : > { %v985_v43 = vmul.f32 %v1413_v42, %v1200_v39  ;;  %v930_v14 = vpop.f32.mrb[17].mxu0 }
 0x2b3   : > { %v984_v47 = vmul.f32 %v1200_v39, %v930_v14 }
 0x2b4   : > { %v993_v15 = vmul.f32 %v985_v43, %v970_v0 }
 0x2b5   : > { %v992_v16 = vmul.f32 %v984_v47, %v969_v2  ;;  %v1416_v50 = vpop.f32.mrb[18].mxu0 }
 0x2b6   : > { %v1008_v17 = vadd.f32 %v1201_v46, %v993_v15  ;;  %v987_v18 = vmul.f32 %v1416_v50, %v1200_v39  ;;  %v940_v51 = vpop.f32.mrb[19].mxu0 }
 0x2b7   : > { %v1007_v19 = vadd.f32 %v1201_v46, %v992_v16  ;;  %v986_v20 = vmul.f32 %v1200_v39, %v940_v51 }
 0x2b8   : > { %1016 = vst [vmem:[%s1867_s21 + $0x8] sm:$0xff] %v1008_v17  ;;  %v995_v21 = vmul.f32 %v987_v18, %v972_v4 }
 0x2b9   : > { %1015 = vst [vmem:[%s1867_s21] sm:$0xff] %v1007_v19  ;;  %v994_v22 = vmul.f32 %v986_v20, %v971_v6  ;;  %v1419_v23 = vpop.f32.mrb[20].mxu0 }
 0x2ba   : > { %v1010_v24 = vadd.f32 %v1201_v46, %v995_v21  ;;  %v989_v25 = vmul.f32 %v1419_v23, %v1200_v39  ;;  %v950_v26 = vpop.f32.mrb[21].mxu0 }
 0x2bb   : > { %v1009_v27 = vadd.f32 %v1201_v46, %v994_v22  ;;  %v988_v28 = vmul.f32 %v1200_v39, %v950_v26 }
 0x2bc   : > { %1018 = vst [vmem:[%s1867_s21 + $0x18] sm:$0xff] %v1010_v24  ;;  %v997_v29 = vmul.f32 %v989_v25, %v974_v8 }
 0x2bd   : > { %1017 = vst [vmem:[%s1867_s21 + $0x10] sm:$0xff] %v1009_v27  ;;  %v996_v30 = vmul.f32 %v988_v28, %v973_v10  ;;  %v1422_v31 = vpop.f32.mrb[16].mxu1 }
 0x2be   : > { %v1012_v32 = vadd.f32 %v1201_v46, %v997_v29  ;;  %v991_v33 = vmul.f32 %v1422_v31, %v1200_v39  ;;  %v960_v34 = vpop.f32.mrb[17].mxu1 }
 0x2bf   : > { %v1011_v35 = vadd.f32 %v1201_v46, %v996_v30  ;;  %v990_v36 = vmul.f32 %v1200_v39, %v960_v34  ;;  %1029 = sbr.rel (!%p1706_p5) target bundleno = 718 (0x2ce), region = 48  ;;  %v1079_v48 = vld [vmem:[%s1867_s21 + $0x8] sm:$0xff] (%p1706_p5) }
 0x2c0   : > { %1020 = vst [vmem:[%s1867_s21 + $0x28] sm:$0xff] %v1012_v32  ;;  %v999_v37 = vmul.f32 %v991_v33, %v976_v12  ;;  %v1077_v45 = vld [vmem:[%s1867_s21] sm:$0xff] (%p1706_p5)  ;;  %1080 = vst [vmem:[%s1035_s19 + $0x20] sm:$0xff] (%p1706_p5), %v1079_v48 }
 0x2c1   : > { %1019 = vst [vmem:[%s1867_s21 + $0x20] sm:$0xff] %v1011_v35  ;;  %v998_v40 = vmul.f32 %v990_v36, %v975_v38  ;;  %1078 = vst [vmem:[%s1035_s19] sm:$0xff] (%p1706_p5), %v1077_v45 }
 0x2c2   : > { %v1014_v41 = vadd.f32 %v1201_v46, %v999_v37 }
 0x2c3   : > { %v1013_v44 = vadd.f32 %v1201_v46, %v998_v40  ;;  %v1083_v52 = vld [vmem:[%s1867_s21 + $0x18] sm:$0xff] (%p1706_p5) }
 0x2c4   : > { %1022 = vst [vmem:[%s1867_s21 + $0x38] sm:$0xff] %v1014_v41  ;;  %v1081_v49 = vld [vmem:[%s1867_s21 + $0x10] sm:$0xff] (%p1706_p5)  ;;  %1084 = vst [vmem:[%s1035_s19 + $0x60] sm:$0xff] (%p1706_p5), %v1083_v52 }
 0x2c5   : > { %1021 = vst [vmem:[%s1867_s21 + $0x30] sm:$0xff] %v1013_v44  ;;  %1082 = vst [vmem:[%s1035_s19 + $0x40] sm:$0xff] (%p1706_p5), %v1081_v49 }
 0x2c7   : > { %v1087_v54 = vld [vmem:[%s1867_s21 + $0x28] sm:$0xff] }
 0x2c8   : > { %v1085_v53 = vld [vmem:[%s1867_s21 + $0x20] sm:$0xff]  ;;  %1088 = vst [vmem:[%s1035_s19 + $0xa0] sm:$0xff] %v1087_v54 }
 0x2c9   : > { %1086 = vst [vmem:[%s1035_s19 + $0x80] sm:$0xff] %v1085_v53 }
 0x2cb   : > { %v1091_v56 = vld [vmem:[%s1867_s21 + $0x38] sm:$0xff] }
 0x2cc   : > { %v1089_v55 = vld [vmem:[%s1867_s21 + $0x30] sm:$0xff]  ;;  %1092 = vst [vmem:[%s1035_s19 + $0xe0] sm:$0xff] %v1091_v56 }
 0x2cd   : > { %1090 = vst [vmem:[%s1035_s19 + $0xc0] sm:$0xff] %v1089_v55 }
 0x2ce PF: > { %s16_s27 = sadd.s32 1, %s1623_s27   ;;  %s1921_s21 = smov %s1603_s22 }
 0x2cf   : > { %p13_p10 = scmp.ge.s32.totalorder %s16_s27, 10   ;;  %s1922_s22 = smov %s1717_s12 }
 0x2d0   : > { %s1923_s23 = smov %s1615_s25  ;;  %s1924_s24 = smov %s1619_s26 }
 0x2d1   : > { %s1925_s25 = smov %s1928_s28  ;;  %s1926_s26 = smov %s1932_s29 }
 0x2d2   :  { %15 = sbr.rel (!%p13_p10) target bundleno = 4 (0x4), region = 113 }

</bundles_post_ra>
